<compile_context>
chip_gen: v6e
topology: v6e:2x2x1
jax: 0.10.0
libtpu: 0.0.40
codegen_flags: <defaults>
</compile_context>

<pallas_src>
import functools

import jax
import jax.numpy as jnp
import numpy as np
from jax.experimental import pallas as pl
from jax.experimental.pallas import tpu as pltpu


def _bn_relu(y, mask, gamma, beta, m_count, eps):
    """Training-mode BatchNorm (biased batch stats over masked valid columns) + ReLU."""
    inv_m = 1.0 / float(m_count)
    mean = jnp.sum(y * mask, axis=1, keepdims=True) * inv_m           # (Cout, 1)
    d = (y - mean) * mask
    var = jnp.sum(d * d, axis=1, keepdims=True) * inv_m               # (Cout, 1), biased
    scale = gamma * jax.lax.rsqrt(var + eps)
    shift = beta - mean * scale
    return jnp.maximum(y * scale + shift, 0.0)


def _fused_two_layer_kernel(xs1_ref, w1_ref, p1_ref, w2_ref, p2_ref,
                            m1_ref, m2_ref, o_ref, *, K, NLp, M1, M2, eps):
    # ---- layer 1: one lane-aligned MXU matmul (contraction = K*Cin) + bias ----
    y1 = jnp.dot(w1_ref[...], xs1_ref[...], preferred_element_type=jnp.float32)
    y1 = y1 + p1_ref[0]                                               # (Cout, NLp)
    a1 = _bn_relu(y1, m1_ref[...], p1_ref[1], p1_ref[2], M1, eps)

    # ---- layer 2: K shifted matmuls on the resident activation slab ----
    # The shift-by-k is a lane rotation on the XLU (free slot), never a masked load.
    acc = jnp.dot(w2_ref[0], a1, preferred_element_type=jnp.float32)
    for k in range(1, K):                                             # K tiny & static
        a1k = pltpu.roll(a1, NLp - k, 1)        # column j <- a1[:, j + k]
        acc = acc + jnp.dot(w2_ref[k], a1k, preferred_element_type=jnp.float32)
    y2 = acc + p2_ref[0]
    o_ref[...] = _bn_relu(y2, m2_ref[...], p2_ref[1], p2_ref[2], M2, eps)


@jax.jit
def cnn_extraction_layer(x_ncl, params):
    """Matches CNN_Extraction_Layer.forward for an (N, C, L) input tensor."""
    eps = 1e-5
    N, Cin, L = x_ncl.shape
    Cout, _, K = params["w1"].shape
    Lout1 = L - (K - 1)
    Lout2 = Lout1 - (K - 1)

    Lp = 128 * pl.cdiv(L, 128)             # per-batch lane block, 128-aligned
    NLp = N * Lp

    # --- wrapper glue (pure XLA): channel-first, pad L, pre-stack K shifted copies ---
    xf = jnp.transpose(x_ncl, (1, 0, 2)).astype(jnp.float32)           # (Cin, N, L)
    x_pad = jnp.pad(xf, ((0, 0), (0, 0), (0, Lp - L)))                 # (Cin, N, Lp)
    shifted = [jnp.pad(x_pad[:, :, k:], ((0, 0), (0, 0), (0, k))) for k in range(K)]
    xs1 = jnp.concatenate(shifted, axis=0).reshape(K * Cin, NLp)       # (K*Cin, N*Lp)

    # Folded weights: w1f[co, k*Cin + ci] = w1[co, ci, k];  w2k[k] = w2[:, :, k]
    w1f = jnp.transpose(params["w1"], (0, 2, 1)).reshape(Cout, K * Cin).astype(jnp.float32)
    w2k = jnp.transpose(params["w2"], (2, 0, 1)).astype(jnp.float32)   # (K, Cout, Cout)
    p1 = jnp.stack([params["b1"], params["g1"], params["be1"]]).astype(jnp.float32).reshape(3, Cout, 1)
    p2 = jnp.stack([params["b2"], params["g2"], params["be2"]]).astype(jnp.float32).reshape(3, Cout, 1)

    # Precomputed lane-dense validity masks (no integer modulo inside the kernel).
    col = jnp.arange(Lp, dtype=jnp.int32)
    m1 = jnp.tile((col < Lout1).astype(jnp.float32), N).reshape(1, NLp)
    m2 = jnp.tile((col < Lout2).astype(jnp.float32), N).reshape(1, NLp)

    # Explicit VMEM budget for the resident-slab design (generous headroom).
    resident_bytes = 4 * (xs1.size + w1f.size + w2k.size + p1.size + p2.size
                          + m1.size + m2.size + Cout * NLp)
    vmem_limit = int(max(4 * 1024 * 1024, 8 * resident_bytes))

    out2d = pl.pallas_call(
        functools.partial(_fused_two_layer_kernel, K=K, NLp=NLp,
                          M1=N * Lout1, M2=N * Lout2, eps=eps),
        out_shape=jax.ShapeDtypeStruct((Cout, NLp), jnp.float32),
        in_specs=[pl.BlockSpec(memory_space=pltpu.MemorySpace.VMEM)] * 7,
        out_specs=pl.BlockSpec(memory_space=pltpu.MemorySpace.VMEM),
        compiler_params=pltpu.CompilerParams(vmem_limit_bytes=vmem_limit),
    )(xs1, w1f, p1, w2k, p2, m1, m2)

    # Strip lane padding and return NCL.
    y = out2d.reshape(Cout, N, Lp)[:, :, :Lout2]
    return jnp.transpose(y, (1, 0, 2))                                 # (N, Cout, Lout2)


def reference(x_ncl, params, eps=1e-5):
    """Pure-JAX reference (training-mode BN, like a freshly constructed nn.Module)."""
    def layer(x, w, b, g, be):
        y = jax.lax.conv_general_dilated(
            x, w, window_strides=(1,), padding="VALID",
            dimension_numbers=("NCH", "OIH", "NCH"))
        y = y + b.reshape(1, -1, 1)
        mean = jnp.mean(y, axis=(0, 2), keepdims=True)
        var = jnp.mean((y - mean) ** 2, axis=(0, 2), keepdims=True)
        y = (y - mean) / jnp.sqrt(var + eps)
        y = y * g.reshape(1, -1, 1) + be.reshape(1, -1, 1)
        return jnp.maximum(y, 0.0)

    x = layer(x_ncl, params["w1"], params["b1"], params["g1"], params["be1"])
    x = layer(x, params["w2"], params["b2"], params["g2"], params["be2"])
    return x


if __name__ == "__main__":
    # Small shapes consistent with the module: batch=2, in_channels=4,
    # out_channels=8, kernel_size=3, sequence length=32.
    N, Cin, L = 2, 4, 32
    Cout, K = 8, 3

    key = jax.random.PRNGKey(0)
    ks = jax.random.split(key, 5)
    x = jax.random.normal(ks[0], (N, Cin, L), jnp.float32)
    params = {
        # Conv1d weights/biases: deterministic synthetic init.
        "w1": 0.1 * jax.random.normal(ks[1], (Cout, Cin, K), jnp.float32),
        "b1": 0.05 * jax.random.normal(ks[2], (Cout,), jnp.float32),
        "w2": 0.1 * jax.random.normal(ks[3], (Cout, Cout, K), jnp.float32),
        "b2": 0.05 * jax.random.normal(ks[4], (Cout,), jnp.float32),
        # BatchNorm1d affine params: PyTorch defaults (gamma=1, beta=0).
        "g1": jnp.ones((Cout,), jnp.float32),
        "be1": jnp.zeros((Cout,), jnp.float32),
        "g2": jnp.ones((Cout,), jnp.float32),
        "be2": jnp.zeros((Cout,), jnp.float32),
    }

    out = jax.block_until_ready(cnn_extraction_layer(x, params))
    ref = jax.block_until_ready(reference(x, params))

    assert out.shape == (N, Cout, L - 2 * (K - 1)), out.shape
    np.testing.assert_allclose(np.asarray(out), np.asarray(ref), rtol=1e-4, atol=1e-4)
    print("KERNEL_OK")
</pallas_src>

<mosaic_0001>
module attributes {stable_mosaic.version = 11 : i64} {
  func.func @_fused_two_layer_kernel(%arg0: memref<12x256xf32, #tpu.memory_space<vmem>>, %arg1: memref<8x12xf32, #tpu.memory_space<vmem>>, %arg2: memref<3x8x1xf32, #tpu.memory_space<vmem>>, %arg3: memref<3x8x8xf32, #tpu.memory_space<vmem>>, %arg4: memref<3x8x1xf32, #tpu.memory_space<vmem>>, %arg5: memref<1x256xf32, #tpu.memory_space<vmem>>, %arg6: memref<1x256xf32, #tpu.memory_space<vmem>>, %arg7: memref<8x256xf32, #tpu.memory_space<vmem>>) attributes {dimension_semantics = [], scalar_prefetch = 0 : i64, scratch_operands = 0 : i64, tpu.core_type = #tpu.core_type<tc>} {
    %c0 = arith.constant 0 : index
    %c0_0 = arith.constant 0 : index
    %0 = vector.load %arg1[%c0, %c0_0] : memref<8x12xf32, #tpu.memory_space<vmem>>, vector<8x12xf32>
    %c0_1 = arith.constant 0 : index
    %c0_2 = arith.constant 0 : index
    %1 = vector.load %arg0[%c0_1, %c0_2] : memref<12x256xf32, #tpu.memory_space<vmem>>, vector<12x256xf32>
    %cst = arith.constant dense<0.000000e+00> : vector<8x256xf32>
    %2 = tpu.matmul %0, %1, %cst {dimension_numbers = #tpu.dot_dimension_numbers<[1], [0], [0], [1], [0, 0, 1, 1], [], []>} : vector<8x12xf32>, vector<12x256xf32>, vector<8x256xf32> -> vector<8x256xf32>
    %c0_3 = arith.constant 0 : index
    %c0_4 = arith.constant 0 : index
    %c0_5 = arith.constant 0 : index
    %3 = vector.load %arg2[%c0_3, %c0_4, %c0_5] : memref<3x8x1xf32, #tpu.memory_space<vmem>>, vector<1x8x1xf32>
    %4 = vector.shape_cast %3 : vector<1x8x1xf32> to vector<8x1xf32>
    %5 = vector.broadcast %4 : vector<8x1xf32> to vector<8x256xf32>
    %6 = arith.addf %2, %5 : vector<8x256xf32>
    %c0_6 = arith.constant 0 : index
    %c0_7 = arith.constant 0 : index
    %7 = vector.load %arg5[%c0_6, %c0_7] : memref<1x256xf32, #tpu.memory_space<vmem>>, vector<1x256xf32>
    %c1 = arith.constant 1 : index
    %c0_8 = arith.constant 0 : index
    %c0_9 = arith.constant 0 : index
    %8 = vector.load %arg2[%c1, %c0_8, %c0_9] : memref<3x8x1xf32, #tpu.memory_space<vmem>>, vector<1x8x1xf32>
    %9 = vector.shape_cast %8 : vector<1x8x1xf32> to vector<8x1xf32>
    %c2 = arith.constant 2 : index
    %c0_10 = arith.constant 0 : index
    %c0_11 = arith.constant 0 : index
    %10 = vector.load %arg2[%c2, %c0_10, %c0_11] : memref<3x8x1xf32, #tpu.memory_space<vmem>>, vector<1x8x1xf32>
    %11 = vector.shape_cast %10 : vector<1x8x1xf32> to vector<8x1xf32>
    %12 = vector.broadcast %7 : vector<1x256xf32> to vector<8x256xf32>
    %13 = arith.mulf %6, %12 : vector<8x256xf32>
    %cst_12 = arith.constant dense<0.000000e+00> : vector<8xf32>
    %14 = vector.multi_reduction <add>, %13, %cst_12 [1] : vector<8x256xf32> to vector<8xf32>
    %15 = vector.shape_cast %14 : vector<8xf32> to vector<8x1xf32>
    %cst_13 = arith.constant 0.0166666675 : f32
    %16 = vector.broadcast %cst_13 : f32 to vector<8x1xf32>
    %17 = arith.mulf %15, %16 : vector<8x1xf32>
    %18 = vector.broadcast %17 : vector<8x1xf32> to vector<8x256xf32>
    %19 = arith.subf %6, %18 : vector<8x256xf32>
    %20 = vector.broadcast %7 : vector<1x256xf32> to vector<8x256xf32>
    %21 = arith.mulf %19, %20 : vector<8x256xf32>
    %22 = arith.mulf %21, %21 : vector<8x256xf32>
    %cst_14 = arith.constant dense<0.000000e+00> : vector<8xf32>
    %23 = vector.multi_reduction <add>, %22, %cst_14 [1] : vector<8x256xf32> to vector<8xf32>
    %24 = vector.shape_cast %23 : vector<8xf32> to vector<8x1xf32>
    %cst_15 = arith.constant 0.0166666675 : f32
    %25 = vector.broadcast %cst_15 : f32 to vector<8x1xf32>
    %26 = arith.mulf %24, %25 : vector<8x1xf32>
    %cst_16 = arith.constant 9.99999974E-6 : f32
    %27 = vector.broadcast %cst_16 : f32 to vector<8x1xf32>
    %28 = arith.addf %26, %27 : vector<8x1xf32>
    %29 = math.rsqrt %28 : vector<8x1xf32>
    %30 = arith.mulf %9, %29 : vector<8x1xf32>
    %31 = arith.mulf %17, %30 : vector<8x1xf32>
    %32 = arith.subf %11, %31 : vector<8x1xf32>
    %33 = vector.broadcast %30 : vector<8x1xf32> to vector<8x256xf32>
    %34 = arith.mulf %6, %33 : vector<8x256xf32>
    %35 = vector.broadcast %32 : vector<8x1xf32> to vector<8x256xf32>
    %36 = arith.addf %34, %35 : vector<8x256xf32>
    %cst_17 = arith.constant 0.000000e+00 : f32
    %37 = vector.broadcast %cst_17 : f32 to vector<8x256xf32>
    %38 = arith.maximumf %36, %37 : vector<8x256xf32>
    %c0_18 = arith.constant 0 : index
    %c0_19 = arith.constant 0 : index
    %c0_20 = arith.constant 0 : index
    %39 = vector.load %arg3[%c0_18, %c0_19, %c0_20] : memref<3x8x8xf32, #tpu.memory_space<vmem>>, vector<1x8x8xf32>
    %40 = vector.shape_cast %39 : vector<1x8x8xf32> to vector<8x8xf32>
    %cst_21 = arith.constant dense<0.000000e+00> : vector<8x256xf32>
    %41 = tpu.matmul %40, %38, %cst_21 {dimension_numbers = #tpu.dot_dimension_numbers<[1], [0], [0], [1], [0, 0, 1, 1], [], []>} : vector<8x8xf32>, vector<8x256xf32>, vector<8x256xf32> -> vector<8x256xf32>
    %c255_i32 = arith.constant 255 : i32
    %42 = tpu.dynamic_rotate %38 by %c255_i32 dim 1 : vector<8x256xf32>, i32 -> vector<8x256xf32>
    %c1_22 = arith.constant 1 : index
    %c0_23 = arith.constant 0 : index
    %c0_24 = arith.constant 0 : index
    %43 = vector.load %arg3[%c1_22, %c0_23, %c0_24] : memref<3x8x8xf32, #tpu.memory_space<vmem>>, vector<1x8x8xf32>
    %44 = vector.shape_cast %43 : vector<1x8x8xf32> to vector<8x8xf32>
    %cst_25 = arith.constant dense<0.000000e+00> : vector<8x256xf32>
    %45 = tpu.matmul %44, %42, %cst_25 {dimension_numbers = #tpu.dot_dimension_numbers<[1], [0], [0], [1], [0, 0, 1, 1], [], []>} : vector<8x8xf32>, vector<8x256xf32>, vector<8x256xf32> -> vector<8x256xf32>
    %46 = arith.addf %41, %45 : vector<8x256xf32>
    %c254_i32 = arith.constant 254 : i32
    %47 = tpu.dynamic_rotate %38 by %c254_i32 dim 1 : vector<8x256xf32>, i32 -> vector<8x256xf32>
    %c2_26 = arith.constant 2 : index
    %c0_27 = arith.constant 0 : index
    %c0_28 = arith.constant 0 : index
    %48 = vector.load %arg3[%c2_26, %c0_27, %c0_28] : memref<3x8x8xf32, #tpu.memory_space<vmem>>, vector<1x8x8xf32>
    %49 = vector.shape_cast %48 : vector<1x8x8xf32> to vector<8x8xf32>
    %cst_29 = arith.constant dense<0.000000e+00> : vector<8x256xf32>
    %50 = tpu.matmul %49, %47, %cst_29 {dimension_numbers = #tpu.dot_dimension_numbers<[1], [0], [0], [1], [0, 0, 1, 1], [], []>} : vector<8x8xf32>, vector<8x256xf32>, vector<8x256xf32> -> vector<8x256xf32>
    %51 = arith.addf %46, %50 : vector<8x256xf32>
    %c0_30 = arith.constant 0 : index
    %c0_31 = arith.constant 0 : index
    %c0_32 = arith.constant 0 : index
    %52 = vector.load %arg4[%c0_30, %c0_31, %c0_32] : memref<3x8x1xf32, #tpu.memory_space<vmem>>, vector<1x8x1xf32>
    %53 = vector.shape_cast %52 : vector<1x8x1xf32> to vector<8x1xf32>
    %54 = vector.broadcast %53 : vector<8x1xf32> to vector<8x256xf32>
    %55 = arith.addf %51, %54 : vector<8x256xf32>
    %c0_33 = arith.constant 0 : index
    %c0_34 = arith.constant 0 : index
    %56 = vector.load %arg6[%c0_33, %c0_34] : memref<1x256xf32, #tpu.memory_space<vmem>>, vector<1x256xf32>
    %c1_35 = arith.constant 1 : index
    %c0_36 = arith.constant 0 : index
    %c0_37 = arith.constant 0 : index
    %57 = vector.load %arg4[%c1_35, %c0_36, %c0_37] : memref<3x8x1xf32, #tpu.memory_space<vmem>>, vector<1x8x1xf32>
    %58 = vector.shape_cast %57 : vector<1x8x1xf32> to vector<8x1xf32>
    %c2_38 = arith.constant 2 : index
    %c0_39 = arith.constant 0 : index
    %c0_40 = arith.constant 0 : index
    %59 = vector.load %arg4[%c2_38, %c0_39, %c0_40] : memref<3x8x1xf32, #tpu.memory_space<vmem>>, vector<1x8x1xf32>
    %60 = vector.shape_cast %59 : vector<1x8x1xf32> to vector<8x1xf32>
    %61 = vector.broadcast %56 : vector<1x256xf32> to vector<8x256xf32>
    %62 = arith.mulf %55, %61 : vector<8x256xf32>
    %cst_41 = arith.constant dense<0.000000e+00> : vector<8xf32>
    %63 = vector.multi_reduction <add>, %62, %cst_41 [1] : vector<8x256xf32> to vector<8xf32>
    %64 = vector.shape_cast %63 : vector<8xf32> to vector<8x1xf32>
    %cst_42 = arith.constant 0.0178571437 : f32
    %65 = vector.broadcast %cst_42 : f32 to vector<8x1xf32>
    %66 = arith.mulf %64, %65 : vector<8x1xf32>
    %67 = vector.broadcast %66 : vector<8x1xf32> to vector<8x256xf32>
    %68 = arith.subf %55, %67 : vector<8x256xf32>
    %69 = vector.broadcast %56 : vector<1x256xf32> to vector<8x256xf32>
    %70 = arith.mulf %68, %69 : vector<8x256xf32>
    %71 = arith.mulf %70, %70 : vector<8x256xf32>
    %cst_43 = arith.constant dense<0.000000e+00> : vector<8xf32>
    %72 = vector.multi_reduction <add>, %71, %cst_43 [1] : vector<8x256xf32> to vector<8xf32>
    %73 = vector.shape_cast %72 : vector<8xf32> to vector<8x1xf32>
    %cst_44 = arith.constant 0.0178571437 : f32
    %74 = vector.broadcast %cst_44 : f32 to vector<8x1xf32>
    %75 = arith.mulf %73, %74 : vector<8x1xf32>
    %cst_45 = arith.constant 9.99999974E-6 : f32
    %76 = vector.broadcast %cst_45 : f32 to vector<8x1xf32>
    %77 = arith.addf %75, %76 : vector<8x1xf32>
    %78 = math.rsqrt %77 : vector<8x1xf32>
    %79 = arith.mulf %58, %78 : vector<8x1xf32>
    %80 = arith.mulf %66, %79 : vector<8x1xf32>
    %81 = arith.subf %60, %80 : vector<8x1xf32>
    %82 = vector.broadcast %79 : vector<8x1xf32> to vector<8x256xf32>
    %83 = arith.mulf %55, %82 : vector<8x256xf32>
    %84 = vector.broadcast %81 : vector<8x1xf32> to vector<8x256xf32>
    %85 = arith.addf %83, %84 : vector<8x256xf32>
    %cst_46 = arith.constant 0.000000e+00 : f32
    %86 = vector.broadcast %cst_46 : f32 to vector<8x256xf32>
    %87 = arith.maximumf %85, %86 : vector<8x256xf32>
    %c0_47 = arith.constant 0 : index
    %c0_48 = arith.constant 0 : index
    %88 = vector.load %arg7[%c0_47, %c0_48] : memref<8x256xf32, #tpu.memory_space<vmem>>, vector<8x256xf32>
    tpu.vector_store %arg7[%c0_47, %c0_48], %87 {strides = array<i32>} : memref<8x256xf32, #tpu.memory_space<vmem>>, vector<8x256xf32>,
    return
  }
}

</mosaic_0001>

<bundles_post_ra>
// kernel: tile.13
= control target key start
LH: loop header
LB: loop body
LE: loop exit
PB: predicated region body
PF: predicated region fallthrough
CT: control target
= control target key end

     0   :  { %s22_s0 = inlined_call_operand.vmem [shape: f32[128], index: 0, kind: input, shape index: {}]   ;;  %s23_s1 = inlined_call_operand.vmem [shape: f32[2,128], index: 1, kind: output, shape index: {}]  }
   0x1   :  { %v4_v0 = vld [vmem:[%s22_s0] ss:$0 sm:$0xff] }
   0x2   :  { %5 = vst [vmem:[%s23_s1] sm:$0x3] %v4_v0 }

// kernel: cnn_extraction_layer.1
= control target key start
LH: loop header
LB: loop body
LE: loop exit
PB: predicated region body
PF: predicated region fallthrough
CT: control target
= control target key end

     0   :  { %vm41_vm0 = vcmask 1043456   ;;  %v507_v3 = vmov 0.0   ;;  %v508_v4 = vmov 0   ;;  %vm37_vm1 = vcmask 97280   ;;  %s509_s16 = smov 126   ;;  %s510_s17 = smov 127   ;;  %s624_s0 = inlined_call_operand.vmem [shape: f32[12,256], index: 0, kind: input, shape index: {}]   ;;  %s625_s1 = inlined_call_operand.vmem [shape: f32[8,12], index: 1, kind: input, shape index: {}]   ;;  %s626_s2 = inlined_call_operand.vmem [shape: f32[3,8,1], index: 2, kind: input, shape index: {}]   ;;  %s627_s5 = inlined_call_operand.vmem [shape: f32[1,256], index: 5, kind: input, shape index: {}]   ;;  %s628_s4 = inlined_call_operand.vmem [shape: f32[3,8,1], index: 4, kind: input, shape index: {}]   ;;  %s629_s3 = inlined_call_operand.vmem [shape: f32[3,8,8], index: 3, kind: input, shape index: {}]   ;;  %s630_s6 = inlined_call_operand.vmem [shape: f32[1,256], index: 6, kind: input, shape index: {}]   ;;  %s631_s7 = inlined_call_operand.vmem [shape: f32[8,256], index: 7, kind: output, shape index: {}]  }
   0x1   :  { %v30_v0 = vld [vmem:[%s624_s0 + $0x18] sm:$0xf]  ;;  %v29_v1 = vld [vmem:[%s624_s0 + $0x10] sm:$0xf]  ;;  %v28_v2 = vld [vmem:[%s624_s0 + $0x8] sm:$0xff]  ;;  %112 = vmatprep.mubr.f32.mxu0 %v507_v3  ;;  %501 = vset.pattern.permute.xlu0 %v508_v4  ;;  %v125_v8 = vlaneseq  ;;  %vm184_vm3 = vcmask 64512  }
   0x2   :  { %485 = vmatprep.subr.msk.mxu0 %vm41_vm0, %v30_v0  ;;  %v27_v5 = vld [vmem:[%s624_s0] sm:$0xff]  ;;  %502 = vset.pattern.permute.xlu1 %v508_v4  ;;  %v488_v35 = vld [vmem:[%s626_s2 + $0x8] sm:$0xff]  ;;  %v489_v38 = vld [vmem:[%s626_s2 + $0x10] sm:$0xff] }
   0x3   :  { %v31_v6 = vld [vmem:[%s626_s2] sm:$0xff]  ;;  %486 = vmatpush1.msk.msra.mxu0 %vm41_vm0, %v29_v1  ;;  %252 = vmatprep.mubr.f32.mxu1 %v507_v3  ;;  %v572_v9 = vshrl.u32 %v125_v8, 7  ;;  %v178_v50 = vand.u32 127, %v125_v8  ;;  %v490_v55 = vld [vmem:[%s629_s3 + $0x8] sm:$0xff]  ;;  %v493_v61 = vld [vmem:[%s629_s3 + $0x10] sm:$0xff] }
   0x4   :  { %v26_v7 = vld [vmem:[%s625_s1] sm:$0xff]  ;;  %34 = vperm.xlu0 %501, %v31_v6   ;;  %78 = vmatprep.subr.mxu0 %v28_v2 }
   0x5   :  { %79 = vmatpush1.msra.mxu0 %v27_v5  ;;  %v127_v10 = vsub.s32 0, %v572_v9  ;;  %v131_v11 = vsub.s32 1, %v572_v9  ;;  %v119_v13 = vld [vmem:[%s627_s5] sm:$0x3]  ;;  %vm179_vm2 = vcmp.lt.s32.totalorder %v178_v50, 127  ;;  %vm337_vm4 = vcmp.lt.s32.totalorder %v178_v50, 126 }
   0x6   :  { %487 = vmatmul.mubr.msk.f32.vlgmr.msra.gmra.mxu0 %vm37_vm1, %v26_v7  ;;  %v418_v49 = vld [vmem:[%s628_s4] sm:$0xff]  ;;  %v495_v9 = vld [vmem:[%s628_s4 + $0x8] sm:$0xff] }
   0x7   :  { %409 = vmatprep.mubr.f32.mxu0 %v507_v3  ;;  %v128_v16 = vrot.slane %v119_v13, %v127_v10  ;;  %v132_v17 = vrot.slane %v119_v13, %v131_v11  ;;  %v172_v60 = vld [vmem:[%s629_s3] sm:$0xff] }
   0x8   :  { %v426_v4 = vld [vmem:[%s630_s6] sm:$0x3] }
  0x7f   :  { %v35_v12 = vpop.permute.xlu0 %34 }
  0xc6   :  { %v114_v14 = vpop.f32.mrf.mxu0 }
  0xc7   :  { %v115_v15 = vadd.f32 %v114_v14, %v35_v12  ;;  %v435_v14 = vrot.slane %v426_v4, %v127_v10 }
  0xc8   :  { %v116_v18 = vpop.f32.mrf.mxu0 }
  0xc9   :  { %v117_v19 = vadd.f32 %v116_v18, %v35_v12  ;;  %v135_v20 = vmul.f32 %v128_v16, %v115_v15 }
  0xcb   :  { %v136_v21 = vmul.f32 %v132_v17, %v117_v19 }
  0xcd   :  { %v137_v22 = vadd.f32 %v136_v21, %v135_v20 }
  0xcf   :  { %138 = vadd.xlane.f32.xlu0 %v137_v22 }
 0x158   :  { %v139_v23 = vpop.xlane.xlu0 %138 }
 0x159   :  { %v140_v24 = vmul.f32 0.016666668, %v139_v23 }
 0x15b   :  { %v141_v25 = vsub.f32 %v115_v15, %v140_v24  ;;  %v142_v26 = vsub.f32 %v117_v19, %v140_v24 }
 0x15d   :  { %v143_v27 = vmul.f32 %v141_v25, %v128_v16  ;;  %v144_v28 = vmul.f32 %v142_v26, %v132_v17 }
 0x15f   :  { %v145_v29 = vmul.f32 %v143_v27, %v143_v27  ;;  %v146_v30 = vmul.f32 %v144_v28, %v144_v28 }
 0x161   :  { %v147_v31 = vadd.f32 %v146_v30, %v145_v29 }
 0x163   :  { %148 = vadd.xlane.f32.xlu1 %v147_v31 }
 0x1ec   :  { %v149_v32 = vpop.xlane.xlu1 %148 }
 0x1ed   :  { %v150_v33 = vmul.f32 0.016666668, %v149_v32  ;;  %v496_v32 = vld [vmem:[%s628_s4 + $0x10] sm:$0xff] }
 0x1ef   :  { %v151_v34 = vadd.f32 1e-05, %v150_v33 }
 0x1f1   :  { %503 = vrsqrt.f32 %v151_v34 }
 0x1fe   :  { %v504_v36 = vpop.eup %503 }
 0x1ff   :  { %v153_v37 = vmul.f32 %v504_v36, %v488_v35 }
 0x201   :  { %158 = vperm.xlu1 %502, %v153_v37   ;;  %v154_v39 = vmul.f32 %v153_v37, %v140_v24 }
 0x203   :  { %v155_v40 = vsub.f32 %v489_v38, %v154_v39 }
 0x205   :  { %165 = vperm.xlu1 %502, %v155_v40  }
 0x27c   :  { %v159_v41 = vpop.permute.xlu1 %158 }
 0x27d   :  { %v161_v42 = vmul.f32 %v159_v41, %v115_v15  ;;  %v162_v43 = vmul.f32 %v159_v41, %v117_v19  ;;  %v439_v15 = vrot.slane %v426_v4, %v131_v11 }
 0x280   :  { %v166_v44 = vpop.permute.xlu1 %165 }
 0x281   :  { %v168_v45 = vadd.f32 %v166_v44, %v161_v42  ;;  %v169_v46 = vadd.f32 %v166_v44, %v162_v43 }
 0x283   :  { %v170_v47 = vmax.f32 %v168_v45, 0.0  ;;  %v171_v48 = vmax.f32 %v169_v46, 0.0 }
 0x285   :  { %335 = vrot.lane.b32.xlu0 %v171_v48, %s509_s16  ;;  %173 = vrot.lane.b32.xlu1 %v170_v47, %s510_s17 }
 0x289   :  { %175 = vrot.lane.b32.xlu1 %v171_v48, %s510_s17 }
 0x28d   :  { %333 = vrot.lane.b32.xlu1 %v170_v47, %s509_s16 }
 0x291   :  { %421 = vperm.xlu1 %502, %v418_v49  }
 0x2f7   :  { %v174_v51 = vpop.permute.xlu1 %173  ;;  %v336_v56 = vpop.permute.xlu0 %335 }
 0x2fb   :  { %v176_v52 = vpop.permute.xlu1 %175 }
 0x2fc   :  { %v181_v53 = vsel %vm179_vm2, %v176_v52, %v174_v51  ;;  %v180_v54 = vsel %vm179_vm2, %v174_v51, %v176_v52 }
 0x2fd   :  { %218 = vmatprep.subr.mxu1 %v181_v53 }
 0x2fe   :  { %219 = vmatpush1.msra.mxu1 %v180_v54 }
 0x2ff   :  { %491 = vmatmul.mubr.msk.f32.vlgmr.msra.gmra.mxu1 %vm184_vm3, %v490_v55  ;;  %292 = vmatprep.subr.mxu1 %v171_v48  ;;  %v334_v57 = vpop.permute.xlu1 %333 }
 0x300   :  { %v338_v58 = vsel %vm337_vm4, %v334_v57, %v336_v56  ;;  %293 = vmatpush1.msra.mxu1 %v170_v47  ;;  %v339_v59 = vsel %vm337_vm4, %v336_v56, %v334_v57  ;;  %326 = vmatprep.mubr.f32.mxu1 %v507_v3 }
 0x301   :  { %375 = vmatprep.subr.mxu0 %v339_v59 }
 0x302   :  { %376 = vmatpush1.msra.mxu0 %v338_v58 }
 0x303   :  { %492 = vmatmul.mubr.msk.f32.vlgmr.msra.gmra.mxu1 %vm184_vm3, %v172_v60  ;;  %494 = vmatmul.mubr.msk.f32.vlgmr.msra.gmra.mxu0 %vm184_vm3, %v493_v61 }
 0x30c   :  { %v422_v7 = vpop.permute.xlu1 %421 }
 0x3bf   :  { %v254_v62 = vpop.f32.mrf.mxu1 }
 0x3c1   :  { %v256_v63 = vpop.f32.mrf.mxu1 }
 0x3c3   :  { %v328_v0 = vpop.f32.mrf.mxu1  ;;  %v411_v1 = vpop.f32.mrf.mxu0 }
 0x3c4   :  { %v329_v2 = vadd.f32 %v328_v0, %v254_v62 }
 0x3c5   :  { %v330_v3 = vpop.f32.mrf.mxu1  ;;  %v413_v8 = vpop.f32.mrf.mxu0 }
 0x3c6   :  { %v416_v5 = vadd.f32 %v411_v1, %v329_v2  ;;  %v331_v6 = vadd.f32 %v330_v3, %v256_v63 }
 0x3c8   :  { %v424_v12 = vadd.f32 %v422_v7, %v416_v5  ;;  %v417_v13 = vadd.f32 %v413_v8, %v331_v6 }
 0x3ca   :  { %v425_v16 = vadd.f32 %v422_v7, %v417_v13  ;;  %v442_v17 = vmul.f32 %v435_v14, %v424_v12 }
 0x3cc   :  { %v443_v18 = vmul.f32 %v439_v15, %v425_v16 }
 0x3ce   :  { %v444_v19 = vadd.f32 %v443_v18, %v442_v17 }
 0x3d0   :  { %445 = vadd.xlane.f32.xlu1 %v444_v19 }
 0x459   :  { %v446_v20 = vpop.xlane.xlu1 %445 }
 0x45a   :  { %v447_v21 = vmul.f32 0.017857144, %v446_v20 }
 0x45c   :  { %v448_v22 = vsub.f32 %v424_v12, %v447_v21  ;;  %v449_v23 = vsub.f32 %v425_v16, %v447_v21 }
 0x45e   :  { %v450_v24 = vmul.f32 %v448_v22, %v435_v14  ;;  %v451_v25 = vmul.f32 %v449_v23, %v439_v15 }
 0x460   :  { %v452_v26 = vmul.f32 %v450_v24, %v450_v24  ;;  %v453_v27 = vmul.f32 %v451_v25, %v451_v25 }
 0x462   :  { %v454_v28 = vadd.f32 %v453_v27, %v452_v26 }
 0x464   :  { %455 = vadd.xlane.f32.xlu0 %v454_v28 }
 0x4ed   :  { %v456_v29 = vpop.xlane.xlu0 %455 }
 0x4ee   :  { %v457_v10 = vmul.f32 0.017857144, %v456_v29 }
 0x4f0   :  { %v458_v30 = vadd.f32 1e-05, %v457_v10 }
 0x4f2   :  { %505 = vrsqrt.f32 %v458_v30 }
 0x4ff   :  { %v506_v11 = vpop.eup %505 }
 0x500   :  { %v460_v31 = vmul.f32 %v506_v11, %v495_v9 }
 0x502   :  { %465 = vperm.xlu1 %502, %v460_v31   ;;  %v461_v33 = vmul.f32 %v460_v31, %v447_v21 }
 0x504   :  { %v462_v34 = vsub.f32 %v496_v32, %v461_v33 }
 0x506   :  { %472 = vperm.xlu0 %501, %v462_v34  }
 0x57d   :  { %v466_v35 = vpop.permute.xlu1 %465 }
 0x57e   :  { %v468_v36 = vmul.f32 %v466_v35, %v424_v12  ;;  %v469_v37 = vmul.f32 %v466_v35, %v425_v16 }
 0x581   :  { %v473_v38 = vpop.permute.xlu0 %472 }
 0x582   :  { %v475_v39 = vadd.f32 %v473_v38, %v468_v36  ;;  %v476_v40 = vadd.f32 %v473_v38, %v469_v37 }
 0x584   :  { %v477_v41 = vmax.f32 %v475_v39, 0.0  ;;  %v478_v42 = vmax.f32 %v476_v40, 0.0 }
 0x586   :  { %479 = vst [vmem:[%s631_s7] sm:$0xff] %v477_v41  ;;  %480 = vst [vmem:[%s631_s7 + $0x8] sm:$0xff] %v478_v42 }

</bundles_post_ra>
